<compile_context>
chip_gen: v7x
topology: tpu7x:2x2x1
jax: 0.10.0
libtpu: 0.0.40
codegen_flags: <defaults>
</compile_context>

<pallas_src>
import jax
import jax.numpy as jnp
from jax.experimental import pallas as pl
from jax.experimental.pallas import tpu as pltpu


def _round_up(n, m):
    return ((n + m - 1) // m) * m


def lenet300_kernel(x_ref, w1_ref, b1_ref, w2_ref, b2_ref, w3_ref, b3_ref, o_ref):
    # x_ref: (TB, 784) bf16 tile; weights bf16, biases f32. Accumulate in f32 on the MXU.
    x = x_ref[...]
    h1 = jnp.dot(x, w1_ref[...], preferred_element_type=jnp.float32) + b1_ref[...]
    h1 = jnp.maximum(h1, 0.0).astype(jnp.bfloat16)          # relu(fc1)
    h2 = jnp.dot(h1, w2_ref[...], preferred_element_type=jnp.float32) + b2_ref[...]
    h2 = jnp.maximum(h2, 0.0).astype(jnp.bfloat16)          # relu(fc2)
    o = jnp.dot(h2, w3_ref[...], preferred_element_type=jnp.float32) + b3_ref[...]
    o_ref[...] = o.astype(o_ref.dtype)                      # fc3 (no activation)


def lenet300_forward(x, params, *, block_b=256):
    """x: (B, 1, 28, 28) or (B, 784) float32. Returns (B, 10) float32."""
    w1, b1, w2, b2, w3, b3 = params
    x2 = x.reshape(-1, 784)                                  # x.view(-1, 784)
    B = x2.shape[0]

    # Tile the batch: TB up to 256 rows (MXU-friendly), multiple of 16 for bf16 sublanes.
    tb = min(block_b, _round_up(B, 16))
    B_pad = _round_up(B, tb)
    if B_pad != B:
        x2 = jnp.pad(x2, ((0, B_pad - B), (0, 0)))

    # bf16 operands for HBM/MXU; biases stay f32 (added to f32 accumulators).
    xb = x2.astype(jnp.bfloat16)
    w1b, w2b, w3b = (w.astype(jnp.bfloat16) for w in (w1, w2, w3))
    b1f, b2f, b3f = (b.astype(jnp.float32) for b in (b1, b2, b3))

    # Constant block index -> weights/biases stay resident in VMEM across batch tiles.
    const = lambda a: pl.BlockSpec(a.shape, lambda i: (0,) * a.ndim)

    out = pl.pallas_call(
        lenet300_kernel,
        out_shape=jax.ShapeDtypeStruct((B_pad, 10), jnp.float32),
        grid=(pl.cdiv(B_pad, tb),),
        in_specs=[
            pl.BlockSpec((tb, 784), lambda i: (i, 0)),       # x: streamed per batch tile
            const(w1b), const(b1f),
            const(w2b), const(b2f),
            const(w3b), const(b3f),
        ],
        out_specs=pl.BlockSpec((tb, 10), lambda i: (i, 0)),
        compiler_params=pltpu.CompilerParams(
            dimension_semantics=("parallel",),               # megacore sharding on v7x
        ),
    )(xb, w1b, b1f, w2b, b2f, w3b, b3f)

    return out[:B]


def init_params(key):
    """Deterministic init matching PyTorch nn.Linear shapes (stored transposed)."""
    dims = [(784, 300), (300, 100), (100, 10)]
    params = []
    for i, (fan_in, fan_out) in enumerate(dims):
        kw, kb = jax.random.split(jax.random.fold_in(key, i))
        bound = 1.0 / jnp.sqrt(fan_in)
        w = jax.random.uniform(kw, (fan_in, fan_out), jnp.float32, -bound, bound)
        b = jax.random.uniform(kb, (1, fan_out), jnp.float32, -bound, bound)
        params += [w, b]
    return tuple(params)


def reference_forward(x, params):
    """Mirrors the kernel's numerics: bf16 matmul operands, f32 accumulation/bias/ReLU."""
    w1, b1, w2, b2, w3, b3 = params
    x2 = x.reshape(-1, 784).astype(jnp.bfloat16)
    h1 = jnp.dot(x2, w1.astype(jnp.bfloat16), preferred_element_type=jnp.float32) + b1
    h1 = jnp.maximum(h1, 0.0).astype(jnp.bfloat16)
    h2 = jnp.dot(h1, w2.astype(jnp.bfloat16), preferred_element_type=jnp.float32) + b2
    h2 = jnp.maximum(h2, 0.0).astype(jnp.bfloat16)
    return jnp.dot(h2, w3.astype(jnp.bfloat16), preferred_element_type=jnp.float32) + b3


if __name__ == "__main__":
    key = jax.random.PRNGKey(0)
    params = init_params(key)
    # MNIST-like input: batch=2, NCHW (2, 1, 28, 28) -> flattened to (2, 784)
    x = jax.random.normal(jax.random.fold_in(key, 100), (2, 1, 28, 28), jnp.float32)

    out = jax.block_until_ready(lenet300_forward(x, params))
    ref = reference_forward(x, params)

    assert out.shape == (2, 10), out.shape
    assert jnp.allclose(out, ref, atol=2e-2, rtol=2e-2), "mismatch vs reference"
    print("KERNEL_OK")
</pallas_src>

<mosaic_0001>
module attributes {stable_mosaic.version = 11 : i64} {
  func.func @lenet300_kernel(%arg0: i32, %arg1: memref<16x784xbf16, #tpu.memory_space<vmem>>, %arg2: memref<784x300xbf16, #tpu.memory_space<vmem>>, %arg3: memref<1x300xf32, #tpu.memory_space<vmem>>, %arg4: memref<300x100xbf16, #tpu.memory_space<vmem>>, %arg5: memref<1x100xf32, #tpu.memory_space<vmem>>, %arg6: memref<100x10xbf16, #tpu.memory_space<vmem>>, %arg7: memref<1x10xf32, #tpu.memory_space<vmem>>, %arg8: memref<16x10xf32, #tpu.memory_space<vmem>>) attributes {dimension_semantics = [#tpu.dimension_semantics<parallel>], iteration_bounds = array<i64: 1>, scalar_prefetch = 0 : i64, scratch_operands = 0 : i64, tpu.core_type = #tpu.core_type<tc>, window_params = [{transform_indices = @transform_0, window_bounds = array<i64: 16, 784>}, {pipeline_mode = #tpu.pipeline_mode<synchronous>, transform_indices = @transform_1, window_bounds = array<i64: 784, 300>}, {pipeline_mode = #tpu.pipeline_mode<synchronous>, transform_indices = @transform_2, window_bounds = array<i64: 1, 300>}, {pipeline_mode = #tpu.pipeline_mode<synchronous>, transform_indices = @transform_3, window_bounds = array<i64: 300, 100>}, {pipeline_mode = #tpu.pipeline_mode<synchronous>, transform_indices = @transform_4, window_bounds = array<i64: 1, 100>}, {pipeline_mode = #tpu.pipeline_mode<synchronous>, transform_indices = @transform_5, window_bounds = array<i64: 100, 10>}, {pipeline_mode = #tpu.pipeline_mode<synchronous>, transform_indices = @transform_6, window_bounds = array<i64: 1, 10>}, {transform_indices = @transform_7, window_bounds = array<i64: 16, 10>}]} {
    %c0 = arith.constant 0 : index
    %c0_0 = arith.constant 0 : index
    %0 = vector.load %arg1[%c0, %c0_0] : memref<16x784xbf16, #tpu.memory_space<vmem>>, vector<16x784xbf16>
    %c0_1 = arith.constant 0 : index
    %c0_2 = arith.constant 0 : index
    %1 = vector.load %arg2[%c0_1, %c0_2] : memref<784x300xbf16, #tpu.memory_space<vmem>>, vector<784x300xbf16>
    %cst = arith.constant dense<0.000000e+00> : vector<16x300xf32>
    %2 = tpu.matmul %0, %1, %cst {dimension_numbers = #tpu.dot_dimension_numbers<[1], [0], [0], [1], [0, 0, 1, 1], [], []>} : vector<16x784xbf16>, vector<784x300xbf16>, vector<16x300xf32> -> vector<16x300xf32>
    %c0_3 = arith.constant 0 : index
    %c0_4 = arith.constant 0 : index
    %3 = vector.load %arg3[%c0_3, %c0_4] : memref<1x300xf32, #tpu.memory_space<vmem>>, vector<1x300xf32>
    %4 = vector.broadcast %3 : vector<1x300xf32> to vector<16x300xf32>
    %5 = arith.addf %2, %4 : vector<16x300xf32>
    %cst_5 = arith.constant 0.000000e+00 : f32
    %6 = vector.broadcast %cst_5 : f32 to vector<16x300xf32>
    %7 = arith.maximumf %5, %6 : vector<16x300xf32>
    %8 = arith.truncf %7 : vector<16x300xf32> to vector<16x300xbf16>
    %c0_6 = arith.constant 0 : index
    %c0_7 = arith.constant 0 : index
    %9 = vector.load %arg4[%c0_6, %c0_7] : memref<300x100xbf16, #tpu.memory_space<vmem>>, vector<300x100xbf16>
    %cst_8 = arith.constant dense<0.000000e+00> : vector<16x100xf32>
    %10 = tpu.matmul %8, %9, %cst_8 {dimension_numbers = #tpu.dot_dimension_numbers<[1], [0], [0], [1], [0, 0, 1, 1], [], []>} : vector<16x300xbf16>, vector<300x100xbf16>, vector<16x100xf32> -> vector<16x100xf32>
    %c0_9 = arith.constant 0 : index
    %c0_10 = arith.constant 0 : index
    %11 = vector.load %arg5[%c0_9, %c0_10] : memref<1x100xf32, #tpu.memory_space<vmem>>, vector<1x100xf32>
    %12 = vector.broadcast %11 : vector<1x100xf32> to vector<16x100xf32>
    %13 = arith.addf %10, %12 : vector<16x100xf32>
    %cst_11 = arith.constant 0.000000e+00 : f32
    %14 = vector.broadcast %cst_11 : f32 to vector<16x100xf32>
    %15 = arith.maximumf %13, %14 : vector<16x100xf32>
    %16 = arith.truncf %15 : vector<16x100xf32> to vector<16x100xbf16>
    %c0_12 = arith.constant 0 : index
    %c0_13 = arith.constant 0 : index
    %17 = vector.load %arg6[%c0_12, %c0_13] : memref<100x10xbf16, #tpu.memory_space<vmem>>, vector<100x10xbf16>
    %cst_14 = arith.constant dense<0.000000e+00> : vector<16x10xf32>
    %18 = tpu.matmul %16, %17, %cst_14 {dimension_numbers = #tpu.dot_dimension_numbers<[1], [0], [0], [1], [0, 0, 1, 1], [], []>} : vector<16x100xbf16>, vector<100x10xbf16>, vector<16x10xf32> -> vector<16x10xf32>
    %c0_15 = arith.constant 0 : index
    %c0_16 = arith.constant 0 : index
    %19 = vector.load %arg7[%c0_15, %c0_16] : memref<1x10xf32, #tpu.memory_space<vmem>>, vector<1x10xf32>
    %20 = vector.broadcast %19 : vector<1x10xf32> to vector<16x10xf32>
    %21 = arith.addf %18, %20 : vector<16x10xf32>
    %c0_17 = arith.constant 0 : index
    %c0_18 = arith.constant 0 : index
    %22 = vector.load %arg8[%c0_17, %c0_18] : memref<16x10xf32, #tpu.memory_space<vmem>>, vector<16x10xf32>
    tpu.vector_store %arg8[%c0_17, %c0_18], %21 {strides = array<i32>} : memref<16x10xf32, #tpu.memory_space<vmem>>, vector<16x10xf32>,
    return
  }
  func.func @transform_0(%arg0: i32) -> (i32, i32) {
    %c0_i32 = arith.constant 0 : i32
    %c0_i32_0 = arith.constant 0 : i32
    return %arg0, %c0_i32 : i32, i32
  }
  func.func @transform_1(%arg0: i32) -> (i32, i32) {
    %c0_i32 = arith.constant 0 : i32
    %c0_i32_0 = arith.constant 0 : i32
    %c0_i32_1 = arith.constant 0 : i32
    return %c0_i32, %c0_i32_0 : i32, i32
  }
  func.func @transform_2(%arg0: i32) -> (i32, i32) {
    %c0_i32 = arith.constant 0 : i32
    %c0_i32_0 = arith.constant 0 : i32
    %c0_i32_1 = arith.constant 0 : i32
    return %c0_i32, %c0_i32_0 : i32, i32
  }
  func.func @transform_3(%arg0: i32) -> (i32, i32) {
    %c0_i32 = arith.constant 0 : i32
    %c0_i32_0 = arith.constant 0 : i32
    %c0_i32_1 = arith.constant 0 : i32
    return %c0_i32, %c0_i32_0 : i32, i32
  }
  func.func @transform_4(%arg0: i32) -> (i32, i32) {
    %c0_i32 = arith.constant 0 : i32
    %c0_i32_0 = arith.constant 0 : i32
    %c0_i32_1 = arith.constant 0 : i32
    return %c0_i32, %c0_i32_0 : i32, i32
  }
  func.func @transform_5(%arg0: i32) -> (i32, i32) {
    %c0_i32 = arith.constant 0 : i32
    %c0_i32_0 = arith.constant 0 : i32
    %c0_i32_1 = arith.constant 0 : i32
    return %c0_i32, %c0_i32_0 : i32, i32
  }
  func.func @transform_6(%arg0: i32) -> (i32, i32) {
    %c0_i32 = arith.constant 0 : i32
    %c0_i32_0 = arith.constant 0 : i32
    %c0_i32_1 = arith.constant 0 : i32
    return %c0_i32, %c0_i32_0 : i32, i32
  }
  func.func @transform_7(%arg0: i32) -> (i32, i32) {
    %c0_i32 = arith.constant 0 : i32
    %c0_i32_0 = arith.constant 0 : i32
    return %arg0, %c0_i32 : i32, i32
  }
}

</mosaic_0001>

<bundles_post_ra>
// kernel: tpu_custom_call.1
= control target key start
LH: loop header
LB: loop body
LE: loop exit
PB: predicated region body
PF: predicated region fallthrough
CT: control target
= control target key end

     0   :  { %v2395_v2 = vmov 0   ;;  %vm1068_vm0 = vcmask 130048   ;;  %vm2397_vm1 = vmmov 0   ;;  %s3045_s0 = inlined_call_operand.vmem [shape: bf16[16,784], index: 0, kind: input, shape index: {}]   ;;  %s3046_s1 = inlined_call_operand.vmem [shape: bf16[784,300], index: 1, kind: input, shape index: {}]   ;;  %s3047_s2 = inlined_call_operand.vmem [shape: f32[1,300], index: 2, kind: input, shape index: {}]   ;;  %s3048_s3 = inlined_call_operand.vmem [shape: bf16[300,100], index: 3, kind: input, shape index: {}]   ;;  %s3049_s4 = inlined_call_operand.vmem [shape: f32[1,100], index: 4, kind: input, shape index: {}]   ;;  %s3050_s5 = inlined_call_operand.vmem [shape: bf16[100,10], index: 5, kind: input, shape index: {}]   ;;  %s3051_s6 = inlined_call_operand.vmem [shape: f32[1,10], index: 6, kind: input, shape index: {}]   ;;  %s3052_s7 = inlined_call_operand.hbm [shape: f32[16,10], index: 7, kind: output, shape index: {}]  }
   0x1   :  { %v2139_v0 = vld [vmem:[%s3046_s1 + $0x4] ss:$12 sps:$4 sm:$0xff]   ;;  %v2141_v1 = vld [vmem:[%s3046_s1] ss:$12 sps:$4 sm:$0xff]   ;;  %1233 = vmatprep.mubr.bf16.mxu1 %v2395_v2  ;;  %v2142_v3 = vld [vmem:[%s3046_s1 + $0x1c] ss:$12 sps:$4 sm:$0xff]  }
   0x2   :  { %1072 = vmatprep.subr.bf16.mxu0 %v2139_v0  ;;  %v2144_v4 = vld [vmem:[%s3046_s1 + $0x18] ss:$12 sps:$4 sm:$0xff]   ;;  %v2145_v5 = vld [vmem:[%s3046_s1 + $0x34] ss:$12 sps:$4 sm:$0xff]   ;;  %v2147_v6 = vld [vmem:[%s3046_s1 + $0x30] ss:$12 sps:$4 sm:$0xff]  }
   0x3   :  { %1073 = vmatpush1.bf16.msra.mxu0 %v2141_v1  ;;  %v2148_v7 = vld [vmem:[%s3046_s1 + $0x4c] ss:$12 sps:$4 sm:$0xff]   ;;  %v2150_v8 = vld [vmem:[%s3046_s1 + $0x48] ss:$12 sps:$4 sm:$0xff]   ;;  %v2151_v9 = vld [vmem:[%s3046_s1 + $0x64] ss:$12 sps:$4 sm:$0xff]  }
   0x4   :  { %1074 = vmatprep.subr.bf16.mxu0 %v2142_v3  ;;  %v2166_v10 = vld [vmem:[%s3046_s1 + $0x484] ss:$12 sps:$4 sm:$0xff]   ;;  %v2168_v11 = vld [vmem:[%s3046_s1 + $0x480] ss:$12 sps:$4 sm:$0xff]   ;;  %v2154_v13 = vld [vmem:[%s3046_s1 + $0x7c] ss:$12 sps:$4 sm:$0xff]  }
   0x5   :  { %v2153_v12 = vld [vmem:[%s3046_s1 + $0x60] ss:$12 sps:$4 sm:$0xff]   ;;  %1201 = vmatprep.subr.bf16.mxu1 %v2166_v10  ;;  %v2172_v14 = vld [vmem:[%s3046_s1 + $0xc8] ss:$12 sps:$4 sm:$0xff]   ;;  %v2156_v17 = vld [vmem:[%s3046_s1 + $0x78] ss:$12 sps:$4 sm:$0xff]  }
   0x6   :  { %1202 = vmatpush1.bf16.msra.mxu1 %v2168_v11  ;;  %v2486_v15 = vld [vmem:[%s3045_s0 + $0x18] ss:$28 sps:$4 sm:$0xff]   ;;  %v2178_v19 = vld [vmem:[%s3046_s1 + $0xe0] ss:$12 sps:$4 sm:$0xff]   ;;  %v2159_v21 = vld [vmem:[%s3046_s1 + $0x90] ss:$12 sps:$4 sm:$0xff]  }
   0x7   :  { %1075 = vmatpush1.bf16.msra.mxu0 %v2144_v4  ;;  %1981 = vmatprep.subr.bf16.mxu1 %v2172_v14  ;;  %v2174_v16 = vld [vmem:[%s3046_s1 + $0x8] ss:$12 sps:$4 sm:$0xff]   ;;  %v2179_v20 = vld [vmem:[%s3046_s1 + $0x20] ss:$12 sps:$4 sm:$0xff]   ;;  %v2183_v23 = vld [vmem:[%s3046_s1 + $0xf8] ss:$12 sps:$4 sm:$0xff]  }
   0x8   :  { %1076 = vmatprep.subr.bf16.mxu0 %v2145_v5  ;;  %v2157_v18 = vld [vmem:[%s3046_s1 + $0x94] ss:$12 sps:$4 sm:$0xff]   ;;  %v2160_v22 = vld [vmem:[%s3046_s1 + $0xac] ss:$12 sps:$4 sm:$0xff]   ;;  %v2188_v26 = vld [vmem:[%s3046_s1 + $0x110] ss:$12 sps:$4 sm:$0xff]  }
   0x9   :  { %1949 = vmatmul.mubr.msk.bf16.vlgmr.msra.gmra.mrb[0].mxu1 %vm1068_vm0, %v2486_v15  ;;  %v2184_v24 = vld [vmem:[%s3046_s1 + $0x38] ss:$12 sps:$4 sm:$0xff]   ;;  %v2162_v25 = vld [vmem:[%s3046_s1 + $0xa8] ss:$12 sps:$4 sm:$0xff]   ;;  %v2189_v27 = vld [vmem:[%s3046_s1 + $0x50] ss:$12 sps:$4 sm:$0xff]  }
   0xa   :  { %1982 = vmatpush3.bf16.msra.mxu1 %v2174_v16  ;;  %v2163_v28 = vld [vmem:[%s3046_s1 + $0xc4] ss:$12 sps:$4 sm:$0xff]   ;;  %v2193_v29 = vld [vmem:[%s3046_s1 + $0x128] ss:$12 sps:$4 sm:$0xff]   ;;  %v2165_v30 = vld [vmem:[%s3046_s1 + $0xc0] ss:$12 sps:$4 sm:$0xff]  }
   0xb   :  { %1077 = vmatpush1.bf16.msra.mxu0 %v2147_v6  ;;  %1983 = vmatprep.subr.bf16.mxu1 %v2178_v19  ;;  %v2194_v31 = vld [vmem:[%s3046_s1 + $0x68] ss:$12 sps:$4 sm:$0xff]   ;;  %v2198_v33 = vld [vmem:[%s3046_s1 + $0x140] ss:$12 sps:$4 sm:$0xff]   ;;  %v2171_v34 = vld [vmem:[%s3046_s1 + $0xd8] ss:$12 sps:$4 sm:$0xff]  }
   0xc   :  { %1078 = vmatprep.subr.bf16.mxu0 %v2148_v7  ;;  %v2169_v32 = vld [vmem:[%s3046_s1 + $0xdc] ss:$12 sps:$4 sm:$0xff]   ;;  %v2175_v35 = vld [vmem:[%s3046_s1 + $0xf4] ss:$12 sps:$4 sm:$0xff]   ;;  %v2203_v37 = vld [vmem:[%s3046_s1 + $0x158] ss:$12 sps:$4 sm:$0xff]  }
   0xd   :  { %v2199_v36 = vld [vmem:[%s3046_s1 + $0x80] ss:$12 sps:$4 sm:$0xff]   ;;  %v2177_v38 = vld [vmem:[%s3046_s1 + $0xf0] ss:$12 sps:$4 sm:$0xff]   ;;  %v2204_v40 = vld [vmem:[%s3046_s1 + $0x98] ss:$12 sps:$4 sm:$0xff]  }
   0xe   :  { %1984 = vmatpush3.bf16.msra.mxu1 %v2179_v20  ;;  %v2207_v39 = vld [vmem:[%s3045_s0 + $0x4] ss:$28 sps:$4 sm:$0xff]   ;;  %v2180_v41 = vld [vmem:[%s3046_s1 + $0x10c] ss:$12 sps:$4 sm:$0xff]   ;;  %v2211_v42 = vld [vmem:[%s3046_s1 + $0x170] ss:$12 sps:$4 sm:$0xff]  }
   0xf   :  { %1079 = vmatpush1.bf16.msra.mxu0 %v2150_v8  ;;  %1985 = vmatprep.subr.bf16.mxu1 %v2183_v23  ;;  %v2182_v43 = vld [vmem:[%s3046_s1 + $0x108] ss:$12 sps:$4 sm:$0xff]   ;;  %v2185_v44 = vld [vmem:[%s3046_s1 + $0x124] ss:$12 sps:$4 sm:$0xff]   ;;  %v2187_v47 = vld [vmem:[%s3046_s1 + $0x120] ss:$12 sps:$4 sm:$0xff]  }
  0x10   :  { %1080 = vmatprep.subr.bf16.mxu0 %v2151_v9  ;;  %1104 = vmatprep.mubr.bf16.mxu0 %v2207_v39  ;;  %v2212_v45 = vld [vmem:[%s3046_s1 + $0xb0] ss:$12 sps:$4 sm:$0xff]   ;;  %v2216_v46 = vld [vmem:[%s3046_s1 + $0x248] ss:$12 sps:$4 sm:$0xff]   ;;  %v2221_v51 = vld [vmem:[%s3046_s1 + $0x260] ss:$12 sps:$4 sm:$0xff]  }
  0x11   :  { %1276 = vmatprep.mubr.bf16.mxu1 %v2207_v39  ;;  %v2190_v48 = vld [vmem:[%s3046_s1 + $0x13c] ss:$12 sps:$4 sm:$0xff]   ;;  %v2192_v52 = vld [vmem:[%s3046_s1 + $0x138] ss:$12 sps:$4 sm:$0xff]   ;;  %v2195_v53 = vld [vmem:[%s3046_s1 + $0x154] ss:$12 sps:$4 sm:$0xff]  }
  0x12   :  { %1986 = vmatpush3.bf16.msra.mxu1 %v2184_v24  ;;  %v2205_v49 = vld [vmem:[%s3045_s0] ss:$28 sps:$4 sm:$0xff]   ;;  %v2217_v50 = vld [vmem:[%s3046_s1 + $0x188] ss:$12 sps:$4 sm:$0xff]   ;;  %v2226_v55 = vld [vmem:[%s3046_s1 + $0x278] ss:$12 sps:$4 sm:$0xff]  }
  0x13   :  { %1081 = vmatpush1.bf16.msra.mxu0 %v2153_v12  ;;  %1987 = vmatprep.subr.bf16.mxu1 %v2188_v26  ;;  %v2222_v54 = vld [vmem:[%s3046_s1 + $0x1a0] ss:$12 sps:$4 sm:$0xff]   ;;  %v2197_v56 = vld [vmem:[%s3046_s1 + $0x150] ss:$12 sps:$4 sm:$0xff]   ;;  %v2227_v57 = vld [vmem:[%s3046_s1 + $0x1b8] ss:$12 sps:$4 sm:$0xff]  }
  0x14   :  { %1082 = vmatprep.subr.bf16.mxu0 %v2154_v13  ;;  %v2200_v58 = vld [vmem:[%s3046_s1 + $0x16c] ss:$12 sps:$4 sm:$0xff]   ;;  %v2231_v59 = vld [vmem:[%s3046_s1 + $0x290] ss:$12 sps:$4 sm:$0xff]   ;;  %v2202_v60 = vld [vmem:[%s3046_s1 + $0x168] ss:$12 sps:$4 sm:$0xff]  }
  0x15   :  { %v2210_v61 = vld [vmem:[%s3046_s1 + $0x184] ss:$12 sps:$4 sm:$0xff]   ;;  %v2236_v63 = vld [vmem:[%s3046_s1 + $0x2a8] ss:$12 sps:$4 sm:$0xff]   ;;  %v2208_v0 = vld [vmem:[%s3046_s1 + $0x180] ss:$12 sps:$4 sm:$0xff]  }
  0x16   :  { %1988 = vmatpush3.bf16.msra.mxu1 %v2189_v27  ;;  %v2232_v62 = vld [vmem:[%s3046_s1 + $0x1d0] ss:$12 sps:$4 sm:$0xff]   ;;  %v2237_v2 = vld [vmem:[%s3046_s1 + $0x1e8] ss:$12 sps:$4 sm:$0xff]   ;;  %v2241_v3 = vld [vmem:[%s3046_s1 + $0x2c0] ss:$12 sps:$4 sm:$0xff]  }
  0x17   :  { %1083 = vmatpush1.bf16.msra.mxu0 %v2156_v17  ;;  %1989 = vmatprep.subr.bf16.mxu1 %v2193_v29  ;;  %v2215_v1 = vld [vmem:[%s3046_s1 + $0x19c] ss:$12 sps:$4 sm:$0xff]   ;;  %v2213_v4 = vld [vmem:[%s3046_s1 + $0x198] ss:$12 sps:$4 sm:$0xff]   ;;  %v2220_v5 = vld [vmem:[%s3046_s1 + $0x1b4] ss:$12 sps:$4 sm:$0xff]  }
  0x18   :  { %1084 = vmatprep.subr.bf16.mxu0 %v2157_v18  ;;  %v2242_v6 = vld [vmem:[%s3046_s1 + $0x200] ss:$12 sps:$4 sm:$0xff]   ;;  %v2246_v7 = vld [vmem:[%s3046_s1 + $0x2d8] ss:$12 sps:$4 sm:$0xff]   ;;  %v2218_v8 = vld [vmem:[%s3046_s1 + $0x1b0] ss:$12 sps:$4 sm:$0xff]  }
  0x19   :  { %v2225_v9 = vld [vmem:[%s3046_s1 + $0x1cc] ss:$12 sps:$4 sm:$0xff]   ;;  %v2251_v12 = vld [vmem:[%s3046_s1 + $0x2f0] ss:$12 sps:$4 sm:$0xff]   ;;  %v2223_v13 = vld [vmem:[%s3046_s1 + $0x1c8] ss:$12 sps:$4 sm:$0xff]  }
  0x1a   :  { %1990 = vmatpush3.bf16.msra.mxu1 %v2194_v31  ;;  %v2247_v10 = vld [vmem:[%s3046_s1 + $0x218] ss:$12 sps:$4 sm:$0xff]   ;;  %v2258_v11 = vld [vmem:[%s3045_s0 + $0xc] ss:$28 sps:$4 sm:$0xff]   ;;  %v2252_v16 = vld [vmem:[%s3046_s1 + $0x230] ss:$12 sps:$4 sm:$0xff]  }
  0x1b   :  { %1085 = vmatpush1.bf16.msra.mxu0 %v2159_v21  ;;  %1991 = vmatprep.subr.bf16.mxu1 %v2198_v33  ;;  %v2230_v14 = vld [vmem:[%s3046_s1 + $0x1e4] ss:$12 sps:$4 sm:$0xff]   ;;  %v2259_v17 = vld [vmem:[%s3046_s1 + $0x3c8] ss:$12 sps:$4 sm:$0xff]   ;;  %v2228_v18 = vld [vmem:[%s3046_s1 + $0x1e0] ss:$12 sps:$4 sm:$0xff]  }
  0x1c   :  { %1086 = vmatprep.subr.bf16.mxu0 %v2160_v22  ;;  %v2235_v19 = vld [vmem:[%s3046_s1 + $0x1fc] ss:$12 sps:$4 sm:$0xff]   ;;  %v2264_v22 = vld [vmem:[%s3046_s1 + $0x3e0] ss:$12 sps:$4 sm:$0xff]   ;;  %v2233_v23 = vld [vmem:[%s3046_s1 + $0x1f8] ss:$12 sps:$4 sm:$0xff]  }
  0x1d   :  { %v2694_v20 = vld [vmem:[%s3045_s0 + $0x8] ss:$28 sps:$4 sm:$0xff]   ;;  %v2265_v24 = vld [vmem:[%s3046_s1 + $0x320] ss:$12 sps:$4 sm:$0xff]   ;;  %v2238_v27 = vld [vmem:[%s3046_s1 + $0x210] ss:$12 sps:$4 sm:$0xff]  }
  0x1e   :  { %1992 = vmatpush3.bf16.msra.mxu1 %v2199_v36  ;;  %v2260_v21 = vld [vmem:[%s3046_s1 + $0x308] ss:$12 sps:$4 sm:$0xff]   ;;  %v2269_v26 = vld [vmem:[%s3046_s1 + $0x3f8] ss:$12 sps:$4 sm:$0xff]   ;;  %v2275_v33 = vld [vmem:[%s3046_s1 + $0x350] ss:$12 sps:$4 sm:$0xff]  }
  0x1f   :  { %1087 = vmatpush1.bf16.msra.mxu0 %v2162_v25  ;;  %1993 = vmatprep.subr.bf16.mxu1 %v2203_v37  ;;  %v2240_v25 = vld [vmem:[%s3046_s1 + $0x214] ss:$12 sps:$4 sm:$0xff]   ;;  %v2270_v29 = vld [vmem:[%s3046_s1 + $0x338] ss:$12 sps:$4 sm:$0xff]   ;;  %v2255_v36 = vld [vmem:[%s3046_s1 + $0x25c] ss:$12 sps:$4 sm:$0xff]  }
  0x20   :  { %1088 = vmatprep.subr.bf16.mxu0 %v2163_v28  ;;  %v2245_v28 = vld [vmem:[%s3046_s1 + $0x22c] ss:$12 sps:$4 sm:$0xff]   ;;  %v2243_v31 = vld [vmem:[%s3046_s1 + $0x228] ss:$12 sps:$4 sm:$0xff]  }
  0x21   :  { %v2280_v37 = vld [vmem:[%s3046_s1 + $0x368] ss:$12 sps:$4 sm:$0xff]   ;;  %v2253_v39 = vld [vmem:[%s3046_s1 + $0x258] ss:$12 sps:$4 sm:$0xff]  }
  0x22   :  { %1994 = vmatpush3.bf16.msra.mxu1 %v2204_v40  ;;  %v2285_v40 = vld [vmem:[%s3046_s1 + $0x380] ss:$12 sps:$4 sm:$0xff]  }
  0x23   :  { %1089 = vmatpush1.bf16.msra.mxu0 %v2165_v30  ;;  %1995 = vmatprep.subr.bf16.mxu1 %v2211_v42  ;;  %v2274_v30 = vld [vmem:[%s3046_s1 + $0x410] ss:$12 sps:$4 sm:$0xff]   ;;  %v2263_v42 = vld [vmem:[%s3046_s1 + $0x274] ss:$12 sps:$4 sm:$0xff]  }
  0x24   :  { %1090 = vmatprep.subr.bf16.mxu0 %v2169_v32  ;;  %v2250_v32 = vld [vmem:[%s3046_s1 + $0x244] ss:$12 sps:$4 sm:$0xff]  }
  0x26   :  { %1996 = vmatpush3.bf16.msra.mxu1 %v2212_v45  ;;  %v2290_v45 = vld [vmem:[%s3046_s1 + $0x398] ss:$12 sps:$4 sm:$0xff]  }
  0x27   :  { %1091 = vmatpush1.bf16.msra.mxu0 %v2171_v34  ;;  %2003 = vmatprep.subr.bf16.mxu1 %v2216_v46  ;;  %v2279_v34 = vld [vmem:[%s3046_s1 + $0x428] ss:$12 sps:$4 sm:$0xff]   ;;  %v2268_v46 = vld [vmem:[%s3046_s1 + $0x28c] ss:$12 sps:$4 sm:$0xff]  }
  0x28   :  { %1092 = vmatprep.subr.bf16.mxu0 %v2175_v35  ;;  %v2248_v35 = vld [vmem:[%s3046_s1 + $0x240] ss:$12 sps:$4 sm:$0xff]  }
  0x29   :  { %1277 = vmatmul.mubr.bf16.vlgmr.msra.gmra.mrb[4].mxu1 %v2205_v49 }
  0x2a   :  { %2004 = vmatpush3.bf16.msra.mxu1 %v2217_v50  ;;  %1317 = vmatprep.mubr.bf16.mxu1 %v2258_v11  ;;  %v2273_v50 = vld [vmem:[%s3046_s1 + $0x2a4] ss:$12 sps:$4 sm:$0xff]  }
  0x2b   :  { %1093 = vmatpush1.bf16.msra.mxu0 %v2177_v38  ;;  %2005 = vmatprep.subr.bf16.mxu1 %v2221_v51  ;;  %v2284_v38 = vld [vmem:[%s3046_s1 + $0x440] ss:$12 sps:$4 sm:$0xff]  }
  0x2c   :  { %1094 = vmatprep.subr.bf16.mxu0 %v2180_v41  ;;  %v2301_v41 = vld [vmem:[%s3045_s0 + $0x14] ss:$28 sps:$4 sm:$0xff]   ;;  %v2271_v51 = vld [vmem:[%s3046_s1 + $0x2a0] ss:$12 sps:$4 sm:$0xff]  }
  0x2e   :  { %2006 = vmatpush3.bf16.msra.mxu1 %v2222_v54  ;;  %v2278_v54 = vld [vmem:[%s3046_s1 + $0x2bc] ss:$12 sps:$4 sm:$0xff]  }
  0x2f   :  { %1095 = vmatpush1.bf16.msra.mxu0 %v2182_v43  ;;  %2007 = vmatprep.subr.bf16.mxu1 %v2226_v55  ;;  %v2289_v43 = vld [vmem:[%s3046_s1 + $0x458] ss:$12 sps:$4 sm:$0xff]   ;;  %v2396_v55 = vmov 0.0  }
  0x30   :  { %1096 = vmatprep.subr.bf16.mxu0 %v2185_v44  ;;  %v2261_v44 = vld [vmem:[%s3046_s1 + $0x270] ss:$12 sps:$4 sm:$0xff]  }
  0x32   :  { %2008 = vmatpush3.bf16.msra.mxu1 %v2227_v57  ;;  %v2283_v57 = vld [vmem:[%s3046_s1 + $0x2d4] ss:$12 sps:$4 sm:$0xff]  }
  0x33   :  { %1097 = vmatpush1.bf16.msra.mxu0 %v2187_v47  ;;  %2009 = vmatprep.subr.bf16.mxu1 %v2231_v59  ;;  %v2294_v47 = vld [vmem:[%s3046_s1 + $0x470] ss:$12 sps:$4 sm:$0xff]   ;;  %v2288_v59 = vld [vmem:[%s3046_s1 + $0x2ec] ss:$12 sps:$4 sm:$0xff]  }
  0x34   :  { %1098 = vmatprep.subr.bf16.mxu0 %v2190_v48  ;;  %v2266_v48 = vld [vmem:[%s3046_s1 + $0x288] ss:$12 sps:$4 sm:$0xff]  }
  0x36   :  { %2010 = vmatpush3.bf16.msra.mxu1 %v2232_v62  ;;  %v2291_v62 = vld [vmem:[%s3046_s1 + $0x300] ss:$12 sps:$4 sm:$0xff]  }
  0x37   :  { %1099 = vmatpush1.bf16.msra.mxu0 %v2192_v52  ;;  %2011 = vmatprep.subr.bf16.mxu1 %v2236_v63  ;;  %v2793_v52 = vld [vmem:[%s3045_s0 + $0x10] ss:$28 sps:$4 sm:$0xff]   ;;  %v2298_v63 = vld [vmem:[%s3046_s1 + $0x31c] ss:$12 sps:$4 sm:$0xff]  }
  0x38   :  { %1100 = vmatprep.subr.bf16.mxu0 %v2195_v53  ;;  %v2305_v53 = vld [vmem:[%s3046_s1 + $0x488] ss:$12 sps:$4 sm:$0xff]  }
  0x3a   :  { %2012 = vmatpush3.bf16.msra.mxu1 %v2237_v2  ;;  %v2308_v2 = vld [vmem:[%s3046_s1 + $0x34c] ss:$12 sps:$4 sm:$0xff]  }
  0x3b   :  { %1101 = vmatpush1.bf16.msra.mxu0 %v2197_v56  ;;  %2013 = vmatprep.subr.bf16.mxu1 %v2241_v3  ;;  %v2276_v56 = vld [vmem:[%s3046_s1 + $0x2b8] ss:$12 sps:$4 sm:$0xff]  }
  0x3c   :  { %1102 = vmatprep.subr.bf16.mxu0 %v2200_v58  ;;  %v2281_v58 = vld [vmem:[%s3046_s1 + $0x2d0] ss:$12 sps:$4 sm:$0xff]  }
  0x3e   :  { %2014 = vmatpush3.bf16.msra.mxu1 %v2242_v6 }
  0x3f   :  { %1103 = vmatpush1.bf16.msra.mxu0 %v2202_v60  ;;  %2015 = vmatprep.subr.bf16.mxu1 %v2246_v7  ;;  %v2286_v60 = vld [vmem:[%s3046_s1 + $0x2e8] ss:$12 sps:$4 sm:$0xff]  }
  0x40   :  { %1115 = vmatprep.subr.bf16.mxu0 %v2210_v61  ;;  %v2293_v61 = vld [vmem:[%s3046_s1 + $0x304] ss:$12 sps:$4 sm:$0xff]  }
  0x42   :  { %1105 = vmatmul.mubr.bf16.vlgmr.msra.gmra.mrb[0].mxu0 %v2205_v49  ;;  %2016 = vmatpush3.bf16.msra.mxu1 %v2247_v10  ;;  %v2295_v49 = vld [vmem:[%s3046_s1 + $0x3b0] ss:$12 sps:$4 sm:$0xff]  }
  0x43   :  { %1116 = vmatpush1.bf16.msra.mxu0 %v2208_v0  ;;  %1147 = vmatprep.mubr.bf16.mxu0 %v2258_v11  ;;  %v2296_v0 = vld [vmem:[%s3046_s1 + $0x318] ss:$12 sps:$4 sm:$0xff]  }
  0x44   :  { %1117 = vmatprep.subr.bf16.mxu0 %v2215_v1  ;;  %2017 = vmatprep.subr.bf16.mxu1 %v2251_v12  ;;  %v2302_v1 = vld [vmem:[%s3046_s1 + $0x330] ss:$12 sps:$4 sm:$0xff]  }
  0x46   :  { %2018 = vmatpush3.bf16.msra.mxu1 %v2252_v16 }
  0x47   :  { %1118 = vmatpush1.bf16.msra.mxu0 %v2213_v4  ;;  %2025 = vmatprep.subr.bf16.mxu1 %v2259_v17 }
  0x48   :  { %1119 = vmatprep.subr.bf16.mxu0 %v2220_v5 }
  0x49   :  { %1318 = vmatmul.mubr.bf16.vlgmr.msra.gmra.mrb[8].mxu1 %v2694_v20 }
  0x4a   :  { %2026 = vmatpush3.bf16.msra.mxu1 %v2260_v21  ;;  %1358 = vmatprep.mubr.bf16.mxu1 %v2301_v41 }
  0x4b   :  { %1120 = vmatpush1.bf16.msra.mxu0 %v2218_v8  ;;  %2027 = vmatprep.subr.bf16.mxu1 %v2264_v22 }
  0x4c   :  { %1121 = vmatprep.subr.bf16.mxu0 %v2225_v9 }
  0x4e   :  { %2028 = vmatpush3.bf16.msra.mxu1 %v2265_v24 }
  0x4f   :  { %1122 = vmatpush1.bf16.msra.mxu0 %v2223_v13  ;;  %2029 = vmatprep.subr.bf16.mxu1 %v2269_v26 }
  0x50   :  { %1123 = vmatprep.subr.bf16.mxu0 %v2230_v14 }
  0x52   :  { %2030 = vmatpush3.bf16.msra.mxu1 %v2270_v29 }
  0x53   :  { %1124 = vmatpush1.bf16.msra.mxu0 %v2228_v18  ;;  %2031 = vmatprep.subr.bf16.mxu1 %v2274_v30 }
  0x54   :  { %1125 = vmatprep.subr.bf16.mxu0 %v2235_v19 }
  0x56   :  { %2032 = vmatpush3.bf16.msra.mxu1 %v2275_v33 }
  0x57   :  { %1126 = vmatpush1.bf16.msra.mxu0 %v2233_v23  ;;  %2033 = vmatprep.subr.bf16.mxu1 %v2279_v34 }
  0x58   :  { %1127 = vmatprep.subr.bf16.mxu0 %v2240_v25 }
  0x5a   :  { %2034 = vmatpush3.bf16.msra.mxu1 %v2280_v37 }
  0x5b   :  { %1128 = vmatpush1.bf16.msra.mxu0 %v2238_v27  ;;  %2035 = vmatprep.subr.bf16.mxu1 %v2284_v38 }
  0x5c   :  { %1129 = vmatprep.subr.bf16.mxu0 %v2245_v28 }
  0x5e   :  { %2036 = vmatpush3.bf16.msra.mxu1 %v2285_v40 }
  0x5f   :  { %1130 = vmatpush1.bf16.msra.mxu0 %v2243_v31  ;;  %2037 = vmatprep.subr.bf16.mxu1 %v2289_v43 }
  0x60   :  { %1131 = vmatprep.subr.bf16.mxu0 %v2250_v32 }
  0x62   :  { %2038 = vmatpush3.bf16.msra.mxu1 %v2290_v45 }
  0x63   :  { %1132 = vmatpush1.bf16.msra.mxu0 %v2248_v35  ;;  %2039 = vmatprep.subr.bf16.mxu1 %v2294_v47 }
  0x64   :  { %1133 = vmatprep.subr.bf16.mxu0 %v2255_v36 }
  0x66   :  { %2040 = vmatpush3.bf16.msra.mxu1 %v2295_v49 }
  0x67   :  { %1134 = vmatpush1.bf16.msra.mxu0 %v2253_v39  ;;  %2083 = vmatprep.subr.bf16.mxu1 %v2396_v55 }
  0x68   :  { %1135 = vmatprep.subr.bf16.mxu0 %v2263_v42 }
  0x69   :  { %1359 = vmatmul.mubr.bf16.vlgmr.msra.gmra.mrb[12].mxu1 %v2793_v52 }
  0x6a   :  { %2084 = vmatpush3.bf16.msra.mxu1 %v2305_v53  ;;  %2085 = vmatprep.mubr.msk.bf16.mxu1 %vm2397_vm1, %v2396_v55 }
  0x6b   :  { %1136 = vmatpush1.bf16.msra.mxu0 %v2261_v44 }
  0x6c   :  { %1137 = vmatprep.subr.bf16.mxu0 %v2268_v46 }
  0x6f   :  { %1138 = vmatpush1.bf16.msra.mxu0 %v2266_v48 }
  0x70   :  { %1139 = vmatprep.subr.bf16.mxu0 %v2273_v50 }
  0x71   :  { %2086 = vmatmul.mubr.msk.bf16.vlgmr.msra.gmra.mrb[16].mxu1 %vm1068_vm0, %v2486_v15  ;;  %v2304_v15 = vld [vmem:[%s3046_s1 + $0x334] ss:$12 sps:$4 sm:$0xff]  }
  0x73   :  { %1140 = vmatpush1.bf16.msra.mxu0 %v2271_v51 }
  0x74   :  { %1141 = vmatprep.subr.bf16.mxu0 %v2278_v54 }
  0x77   :  { %1142 = vmatpush1.bf16.msra.mxu0 %v2276_v56 }
  0x78   :  { %1143 = vmatprep.subr.bf16.mxu0 %v2283_v57 }
  0x7b   :  { %1144 = vmatpush1.bf16.msra.mxu0 %v2281_v58 }
  0x7c   :  { %1145 = vmatprep.subr.bf16.mxu0 %v2288_v59 }
  0x7f   :  { %1146 = vmatpush1.bf16.msra.mxu0 %v2286_v60 }
  0x80   :  { %1158 = vmatprep.subr.bf16.mxu0 %v2293_v61 }
  0x82   :  { %1148 = vmatmul.mubr.bf16.vlgmr.msra.gmra.mrb[0].mxu0 %v2694_v20 }
  0x83   :  { %1159 = vmatpush1.bf16.msra.mxu0 %v2291_v62  ;;  %1190 = vmatprep.mubr.bf16.mxu0 %v2301_v41 }
  0x84   :  { %1160 = vmatprep.subr.bf16.mxu0 %v2298_v63 }
  0x87   :  { %1161 = vmatpush1.bf16.msra.mxu0 %v2296_v0 }
  0x88   :  { %1162 = vmatprep.subr.bf16.mxu0 %v2304_v15 }
  0x89   :  { %12 = vsyncpa [#allocation3], 0  ;;  %v2306_v3 = vld [vmem:[%s3046_s1 + $0x348] ss:$12 sps:$4 sm:$0xff]   ;;  %v2311_v4 = vld [vmem:[%s3046_s1 + $0x364] ss:$12 sps:$4 sm:$0xff]   ;;  %v234_v51 = vlaneseq }
  0x8a   :  { %v2309_v5 = vld [vmem:[%s3046_s1 + $0x360] ss:$12 sps:$4 sm:$0xff]   ;;  %v2314_v6 = vld [vmem:[%s3046_s1 + $0x37c] ss:$12 sps:$4 sm:$0xff]   ;;  %v2312_v7 = vld [vmem:[%s3046_s1 + $0x378] ss:$12 sps:$4 sm:$0xff]  }
  0x8b   :  { %1163 = vmatpush1.bf16.msra.mxu0 %v2302_v1  ;;  %v2317_v8 = vld [vmem:[%s3046_s1 + $0x394] ss:$12 sps:$4 sm:$0xff]   ;;  %v2315_v9 = vld [vmem:[%s3046_s1 + $0x390] ss:$12 sps:$4 sm:$0xff]   ;;  %v2320_v10 = vld [vmem:[%s3046_s1 + $0x3ac] ss:$12 sps:$4 sm:$0xff]  }
  0x8c   :  { %1164 = vmatprep.subr.bf16.mxu0 %v2308_v2  ;;  %v2318_v11 = vld [vmem:[%s3046_s1 + $0x3a8] ss:$12 sps:$4 sm:$0xff]   ;;  %v2323_v12 = vld [vmem:[%s3046_s1 + $0x3c4] ss:$12 sps:$4 sm:$0xff]   ;;  %v2321_v13 = vld [vmem:[%s3046_s1 + $0x3c0] ss:$12 sps:$4 sm:$0xff]  }
  0x8d   :  { %v2326_v14 = vld [vmem:[%s3046_s1 + $0x3dc] ss:$12 sps:$4 sm:$0xff]   ;;  %v2324_v16 = vld [vmem:[%s3046_s1 + $0x3d8] ss:$12 sps:$4 sm:$0xff]   ;;  %v2329_v17 = vld [vmem:[%s3046_s1 + $0x3f4] ss:$12 sps:$4 sm:$0xff]  }
  0x8e   :  { %v2327_v18 = vld [vmem:[%s3046_s1 + $0x3f0] ss:$12 sps:$4 sm:$0xff]   ;;  %v2332_v19 = vld [vmem:[%s3046_s1 + $0x40c] ss:$12 sps:$4 sm:$0xff]   ;;  %v2330_v20 = vld [vmem:[%s3046_s1 + $0x408] ss:$12 sps:$4 sm:$0xff]  }
  0x8f   :  { %1165 = vmatpush1.bf16.msra.mxu0 %v2306_v3  ;;  %v2335_v21 = vld [vmem:[%s3046_s1 + $0x424] ss:$12 sps:$4 sm:$0xff]   ;;  %v2333_v22 = vld [vmem:[%s3046_s1 + $0x420] ss:$12 sps:$4 sm:$0xff]   ;;  %v2338_v23 = vld [vmem:[%s3046_s1 + $0x43c] ss:$12 sps:$4 sm:$0xff]  }
  0x90   :  { %1166 = vmatprep.subr.bf16.mxu0 %v2311_v4  ;;  %v2336_v24 = vld [vmem:[%s3046_s1 + $0x438] ss:$12 sps:$4 sm:$0xff]   ;;  %v2341_v25 = vld [vmem:[%s3046_s1 + $0x454] ss:$12 sps:$4 sm:$0xff]   ;;  %v2339_v26 = vld [vmem:[%s3046_s1 + $0x450] ss:$12 sps:$4 sm:$0xff]  }
  0x91   :  { %v2344_v27 = vld [vmem:[%s3046_s1 + $0x46c] ss:$12 sps:$4 sm:$0xff]   ;;  %v2342_v28 = vld [vmem:[%s3046_s1 + $0x468] ss:$12 sps:$4 sm:$0xff]   ;;  %v2345_v29 = vld [vmem:[%s3048_s3 + $0x40] sm:$0xff]   ;;  %v235_v54 = vshrl.u32 %v234_v51, 7 }
  0x92   :  { %v2346_v30 = vld [vmem:[%s3048_s3] sm:$0xff]   ;;  %v2347_v31 = vld [vmem:[%s3048_s3 + $0x48] sm:$0xff]   ;;  %2049 = vmatprep.subr.bf16.mxu1 %v2345_v29  ;;  %v2349_v33 = vld [vmem:[%s3048_s3 + $0x50] sm:$0xff]   ;;  %vm1579_vm2 = vcmask 1045504   ;;  %vm1575_vm3 = vcmask 359424   ;;  %vm1731_vm4 = vcmask 1041408  }
  0x93   :  { %1167 = vmatpush1.bf16.msra.mxu0 %v2309_v5  ;;  %2050 = vmatpush3.bf16.msra.mxu1 %v2346_v30  ;;  %v2348_v32 = vld [vmem:[%s3048_s3 + $0x8] sm:$0xff]   ;;  %v2350_v34 = vld [vmem:[%s3048_s3 + $0x10] sm:$0xff]   ;;  %v2351_v35 = vld [vmem:[%s3048_s3 + $0x58] sm:$0xff]   ;;  %v244_v58 = vsub.s32 2, %v235_v54  ;;  %vm1727_vm5 = vcmask 818176   ;;  %s2398_s11 = smov [#allocation2]  }
  0x94   :  { %1168 = vmatprep.subr.bf16.mxu0 %v2314_v6  ;;  %2051 = vmatprep.subr.bf16.mxu1 %v2347_v31  ;;  %v2352_v36 = vld [vmem:[%s3048_s3 + $0x18] sm:$0xff]   ;;  %v2353_v37 = vld [vmem:[%s3048_s3 + $0x60] sm:$0xff]   ;;  %v2355_v49 = vld [vmem:[%s3048_s3 + $0x68] sm:$0xff]   ;;  %s1784_s12 = sshll.u32 %s2398_s11, 4  ;;  %vm1776_vm6 = vcmask 80896   ;;  %s1785_s12 = int_to_ptr.vmem [resolvable:$true] %s1784_s12 }
  0x95   :  { %v2354_v38 = vld [vmem:[%s3048_s3 + $0x20] sm:$0xff]   ;;  %v2356_v50 = vld [vmem:[%s3048_s3 + $0x28] sm:$0xff]   ;;  %v2358_v53 = vld [vmem:[%s3048_s3 + $0x30] sm:$0xff]   ;;  %p2376_p1 = scmp.lt.s32.totalorder %s1785_s12, %s1785_s12 }
  0x96   :  { %v2359_v56 = vld [vmem:[%s3048_s3 + $0x78] sm:$0xff]   ;;  %v232_v59 = vld [vmem:[%s3047_s2] sm:$0x7]  ;;  %v2365_v51 = vld [vmem:[%s3050_s5 + $0x8] sm:$0xff]  }
  0x97   :  { %1169 = vmatpush1.bf16.msra.mxu0 %v2312_v7  ;;  %2052 = vmatpush3.bf16.msra.mxu1 %v2348_v32  ;;  %v2360_v57 = vld [vmem:[%s3048_s3 + $0x38] sm:$0xff]   ;;  %v245_v60 = vrot.slane %v232_v59, %v244_v58 }
  0x98   :  { %1170 = vmatprep.subr.bf16.mxu0 %v2317_v8  ;;  %2053 = vmatprep.subr.bf16.mxu1 %v2349_v33 }
  0x9b   :  { %1171 = vmatpush1.bf16.msra.mxu0 %v2315_v9  ;;  %2054 = vmatpush3.bf16.msra.mxu1 %v2350_v34 }
  0x9c   :  { %1172 = vmatprep.subr.bf16.mxu0 %v2320_v10  ;;  %2055 = vmatprep.subr.bf16.mxu1 %v2351_v35 }
  0x9f   :  { %1173 = vmatpush1.bf16.msra.mxu0 %v2318_v11  ;;  %2056 = vmatpush3.bf16.msra.mxu1 %v2352_v36 }
  0xa0   :  { %1174 = vmatprep.subr.bf16.mxu0 %v2323_v12  ;;  %2057 = vmatprep.subr.bf16.mxu1 %v2353_v37 }
  0xa3   :  { %1175 = vmatpush1.bf16.msra.mxu0 %v2321_v13  ;;  %2058 = vmatpush3.bf16.msra.mxu1 %v2354_v38 }
  0xa4   :  { %1176 = vmatprep.subr.bf16.mxu0 %v2326_v14  ;;  %2059 = vmatprep.subr.bf16.mxu1 %v2355_v49 }
  0xa7   :  { %1177 = vmatpush1.bf16.msra.mxu0 %v2324_v16  ;;  %2060 = vmatpush3.bf16.msra.mxu1 %v2356_v50  ;;  %v2361_v50 = vld [vmem:[%s3048_s3 + $0x80] sm:$0xff]  }
  0xa8   :  { %1178 = vmatprep.subr.bf16.mxu0 %v2329_v17 }
  0xab   :  { %1179 = vmatpush1.bf16.msra.mxu0 %v2327_v18 }
  0xac   :  { %1180 = vmatprep.subr.bf16.mxu0 %v2332_v19 }
  0xaf   :  { %1181 = vmatpush1.bf16.msra.mxu0 %v2330_v20 }
  0xb0   :  { %1182 = vmatprep.subr.bf16.mxu0 %v2335_v21 }
  0xb3   :  { %1183 = vmatpush1.bf16.msra.mxu0 %v2333_v22 }
  0xb4   :  { %1184 = vmatprep.subr.bf16.mxu0 %v2338_v23 }
  0xb7   :  { %1185 = vmatpush1.bf16.msra.mxu0 %v2336_v24  ;;  %v236_v24 = vsub.s32 0, %v235_v54 }
  0xb8   :  { %1186 = vmatprep.subr.bf16.mxu0 %v2341_v25  ;;  %v240_v25 = vsub.s32 1, %v235_v54  ;;  %v2368_v54 = vld [vmem:[%s3050_s5 + $0x20] sm:$0xff]  }
  0xbb   :  { %1187 = vmatpush1.bf16.msra.mxu0 %v2339_v26  ;;  %v237_v26 = vrot.slane %v232_v59, %v236_v24 }
  0xbc   :  { %1188 = vmatprep.subr.bf16.mxu0 %v2344_v27  ;;  %v241_v27 = vrot.slane %v232_v59, %v240_v25 }
  0xbf   :  { %1189 = vmatpush1.bf16.msra.mxu0 %v2342_v28 }
  0xc2   :  { %1191 = vmatmul.mubr.bf16.vlgmr.msra.gmra.mrb[0].mxu0 %v2793_v52  ;;  %v2357_v52 = vld [vmem:[%s3048_s3 + $0x70] sm:$0xff]  }
  0xc3   :  { %2061 = vmatprep.subr.bf16.mxu1 %v2357_v52  ;;  %v2366_v52 = vld [vmem:[%s3050_s5 + $0x10] sm:$0xff]  }
  0xc4   :  { %2062 = vmatpush3.bf16.msra.mxu1 %v2358_v53  ;;  %v2367_v53 = vld [vmem:[%s3050_s5 + $0x18] sm:$0xff]  }
  0xc5   :  { %2063 = vmatprep.subr.bf16.mxu1 %v2359_v56  ;;  %v2369_v56 = vld [vmem:[%s3050_s5 + $0x28] sm:$0xff]  }
  0xc8   :  { %2064 = vmatpush3.bf16.msra.mxu1 %v2360_v57  ;;  %v2370_v57 = vld [vmem:[%s3050_s5 + $0x30] ss:$0 sps:$4 sm:$0x33]  }
  0xc9   :  { %2089 = vmatprep.subr.bf16.mxu1 %v2396_v55  ;;  %v1733_v58 = vsel %vm1731_vm4, %v2370_v57, 0 }
  0xdc   :  { %v2950_v39 = vpop.f32.mrb[0].mxu1 }
  0xdd   :  { %v2952_v40 = vpop.f32.mrb[1].mxu1 }
  0xde   :  { %v2954_v41 = vpop.f32.mrb[2].mxu1 }
  0xdf   :  { %v2956_v42 = vpop.f32.mrb[3].mxu1 }
  0xfc   :  { %v1997_v43 = vpop.f32.mrb[4].mxu1 }
  0xfd   :  { %v1998_v44 = vpop.f32.mrb[5].mxu1 }
  0xfe   :  { %v1999_v45 = vadd.f32 %v1998_v44, %v1997_v43  ;;  %v2000_v46 = vpop.f32.mrb[6].mxu1 }
  0xff   :  { %v2001_v47 = vpop.f32.mrb[7].mxu1 }
 0x100   :  { %v2002_v48 = vadd.f32 %v2001_v47, %v2000_v46  ;;  %v1279_v61 = vadd.f32 %v1999_v45, %v245_v60 }
 0x102   :  { %v1282_v0 = vadd.f32 %v2002_v48, %v245_v60 }
 0x11c   :  { %v2019_v62 = vpop.f32.mrb[8].mxu1 }
 0x11d   :  { %v2020_v63 = vpop.f32.mrb[9].mxu1 }
 0x11e   :  { %v2021_v15 = vadd.f32 %v2020_v63, %v2019_v62  ;;  %v2022_v1 = vpop.f32.mrb[10].mxu1 }
 0x11f   :  { %v2023_v2 = vpop.f32.mrb[11].mxu1 }
 0x120   :  { %v1320_v3 = vadd.f32 %v2021_v15, %v1279_v61  ;;  %v2024_v4 = vadd.f32 %v2023_v2, %v2022_v1  ;;  %v1951_v15 = vld [vmem:[%s3049_s4] ss:$0 sm:$0xff]  ;;  %s2371_s4 = scalar_lea.vmem %s1785_s12, 256 }
 0x121   :  { %p2372_p0 = scmp.ne.s32.totalorder %s1785_s12, %s2371_s4  ;;  %p2377_p2 = scmp.lt.s32.totalorder %s2371_s4, %s2371_s4 }
 0x122   :  { %v1323_v5 = vadd.f32 %v2024_v4, %v1282_v0 }
 0x123   :  { %p2378_p3 = por %p2377_p2, %p2376_p1 }
 0x125   :  { %p2379_p4 = pnand %p2378_p3, %p2372_p0 }
 0x13c   :  { %v2041_v6 = vpop.f32.mrb[12].mxu1 }
 0x13d   :  { %v2042_v7 = vpop.f32.mrb[13].mxu1 }
 0x13e   :  { %v2043_v8 = vadd.f32 %v2042_v7, %v2041_v6  ;;  %v2044_v9 = vpop.f32.mrb[14].mxu1 }
 0x13f   :  { %v2045_v10 = vpop.f32.mrb[15].mxu1 }
 0x140   :  { %v2046_v11 = vadd.f32 %v2045_v10, %v2044_v9  ;;  %v1361_v12 = vadd.f32 %v2043_v8, %v1320_v3 }
 0x142   :  { %v1364_v13 = vadd.f32 %v2046_v11, %v1323_v5  ;;  %v1972_v11 = vld [vmem:[%s3051_s6] ss:$0 sm:$0xff] }
 0x144   :  { %v1401_v14 = vpop.f32.mrb[16].mxu1 }
 0x145   :  { %v1402_v16 = vadd.f32 %v1401_v14, %v1361_v12  ;;  %v2087_v17 = vpop.f32.mrb[17].mxu1 }
 0x146   :  { %v1404_v18 = vpop.f32.mrb[18].mxu1 }
 0x147   :  { %v1410_v19 = vmax.f32 %v1402_v16, 0.0  ;;  %v1405_v20 = vadd.f32 %v1404_v18, %v1364_v13  ;;  %v2088_v21 = vpop.f32.mrb[19].mxu1 }
 0x149   :  { %v1413_v22 = vmax.f32 %v1405_v20, 0.0 }
 0x14b   :  { %v1416_v23 = vpack.c.bf16 %v1413_v22, %v1410_v19 }
 0x195   :  { %v1192_v28 = vpop.f32.mrb[0].mxu0 }
 0x196   :  { %v2117_v29 = vadd.f32 %v1192_v28, %v237_v26  ;;  %v1194_v30 = vpop.f32.mrb[1].mxu0 }
 0x197   :  { %v2119_v31 = vadd.f32 %v1194_v30, %v241_v27  ;;  %v1196_v32 = vpop.f32.mrb[2].mxu0 }
 0x198   :  { %v2118_v33 = vadd.f32 %v2117_v29, %v2950_v39  ;;  %v2121_v34 = vadd.f32 %v1196_v32, %v237_v26  ;;  %v1198_v35 = vpop.f32.mrb[3].mxu0  ;;  %v2362_v39 = vld [vmem:[%s3048_s3 + $0x88] sm:$0xff]  }
 0x199   :  { %v2120_v36 = vadd.f32 %v2119_v31, %v2952_v40  ;;  %v2123_v37 = vadd.f32 %v1198_v35, %v241_v27  ;;  %v2363_v40 = vld [vmem:[%s3048_s3 + $0x90] sm:$0x3f]  }
 0x19a   :  { %v2122_v38 = vadd.f32 %v2121_v34, %v2954_v41  ;;  %v1408_v44 = vmax.f32 %v2118_v33, 0.0  ;;  %v1581_v41 = vsel %vm1579_vm2, %v2363_v40, 0 }
 0x19b   :  { %v2124_v43 = vadd.f32 %v2123_v37, %v2956_v42  ;;  %v1409_v46 = vmax.f32 %v2120_v36, 0.0  ;;  %v2364_v42 = vld [vmem:[%s3050_s5] sm:$0xff]  }
 0x19c   :  { %v1411_v45 = vmax.f32 %v2122_v38, 0.0 }
 0x19d   :  { %v1412_v47 = vmax.f32 %v2124_v43, 0.0 }
 0x19e   :  { %v1414_v48 = vpack.c.bf16 %v1411_v45, %v1408_v44 }
 0x19f   :  { %v1415_v49 = vpack.c.bf16 %v1412_v47, %v1409_v46 }
 0x1a1   :  { %1615 = vmatprep.mubr.bf16.mxu1 %v1415_v49 }
 0x1a2   :  { %1616 = vmatmul.mubr.bf16.vlgmr.msra.gmra.mrb[20].mxu1 %v1414_v48 }
 0x1a3   :  { %2090 = vmatpush3.bf16.msra.mxu1 %v2361_v50  ;;  %2095 = vmatprep.mubr.msk.bf16.mxu1 %vm2397_vm1, %v2396_v55 }
 0x1a4   :  { %2091 = vmatprep.subr.bf16.mxu1 %v2396_v55 }
 0x1a7   :  { %2092 = vmatpush3.bf16.msra.mxu1 %v2362_v39 }
 0x1a8   :  { %2093 = vmatprep.subr.bf16.mxu1 %v2396_v55 }
 0x1ab   :  { %2094 = vmatpush3.bf16.msra.mxu1 %v1581_v41 }
 0x1ac   :  { %2099 = vmatprep.subr.bf16.mxu1 %v2396_v55 }
 0x1ae   :  { %2096 = vmatmul.mubr.msk.bf16.vlgmr.msra.gmra.mrb[24].mxu1 %vm1575_vm3, %v1416_v23 }
 0x1af   :  { %2100 = vmatpush3.bf16.msra.mxu1 %v2364_v42  ;;  %2113 = vmatprep.mubr.msk.bf16.mxu1 %vm2397_vm1, %v2396_v55 }
 0x1b0   :  { %2101 = vmatprep.subr.bf16.mxu1 %v2396_v55 }
 0x1b3   :  { %2102 = vmatpush3.bf16.msra.mxu1 %v2365_v51 }
 0x1b4   :  { %2103 = vmatprep.subr.bf16.mxu1 %v2396_v55 }
 0x1b7   :  { %2104 = vmatpush3.bf16.msra.mxu1 %v2366_v52 }
 0x1b8   :  { %2105 = vmatprep.subr.bf16.mxu1 %v2396_v55 }
 0x1bb   :  { %2106 = vmatpush3.bf16.msra.mxu1 %v2367_v53 }
 0x1bc   :  { %2107 = vmatprep.subr.bf16.mxu1 %v2396_v55 }
 0x1bf   :  { %2108 = vmatpush3.bf16.msra.mxu1 %v2368_v54 }
 0x1c0   :  { %2109 = vmatprep.subr.bf16.mxu1 %v2396_v55 }
 0x1c3   :  { %2110 = vmatpush3.bf16.msra.mxu1 %v2369_v56 }
 0x1c4   :  { %2111 = vmatprep.subr.bf16.mxu1 %v2396_v55 }
 0x1c7   :  { %2112 = vmatpush3.bf16.msra.mxu1 %v1733_v58 }
 0x275   :  { %v2065_v59 = vpop.f32.mrb[20].mxu1 }
 0x276   :  { %v2066_v60 = vpop.f32.mrb[21].mxu1 }
 0x277   :  { %v2067_v61 = vadd.f32 %v2066_v60, %v2065_v59  ;;  %v2068_v62 = vpop.f32.mrb[22].mxu1 }
 0x278   :  { %v2069_v63 = vpop.f32.mrb[23].mxu1 }
 0x279   :  { %v2070_v0 = vadd.f32 %v2069_v63, %v2068_v62  ;;  %v1618_v1 = vadd.f32 %v2067_v61, %v1951_v15 }
 0x27b   :  { %v1621_v4 = vadd.f32 %v2070_v0, %v1951_v15 }
 0x281   :  { %v1658_v2 = vpop.f32.mrb[24].mxu1 }
 0x282   :  { %v1659_v55 = vadd.f32 %v1658_v2, %v1618_v1  ;;  %v2097_v3 = vpop.f32.mrb[25].mxu1 }
 0x283   :  { %v1661_v5 = vpop.f32.mrb[26].mxu1 }
 0x284   :  { %v1662_v6 = vadd.f32 %v1661_v5, %v1621_v4  ;;  %v2098_v7 = vpop.f32.mrb[27].mxu1  ;;  %v1665_v8 = vmax.f32 %v1659_v55, 0.0 }
 0x286   :  { %v1666_v9 = vmax.f32 %v1662_v6, 0.0 }
 0x288   :  { %v1667_v10 = vpack.c.bf16 %v1666_v9, %v1665_v8 }
 0x28a   :  { %2114 = vmatmul.mubr.msk.bf16.vlgmr.msra.gmra.mrb[28].mxu1 %vm1727_vm5, %v1667_v10 }
 0x35d   :  { %v1769_v12 = vpop.f32.mrb[28].mxu1 }
 0x35e   :  { %v1770_v13 = vadd.f32 %v1972_v11, %v1769_v12  ;;  %v2115_v14 = vpop.f32.mrb[29].mxu1 }
 0x35f   :  { %v1772_v16 = vpop.f32.mrb[30].mxu1 }
 0x360   :  { %1777 = vst.msk [vmem:[#allocation2] sm:$0xff] %vm1776_vm6, %v1770_v13  ;;  %v1773_v17 = vadd.f32 %v1972_v11, %v1772_v16  ;;  %v2116_v18 = vpop.f32.mrb[31].mxu1 }
 0x362   :  { %1778 = vst.msk [vmem:[#allocation2 + $0x8] sm:$0xff] %vm1776_vm6, %v1773_v17 }
 0x363   :  { %2382 = shalt.err (!%p2379_p4)
}
 0x364   :  { %s2383_s13 = scalar_lea.hbm %s3052_s7, 256 }
 0x365   :  { %p2384_p5 = scmp.ne.s32.totalorder %s3052_s7, %s2383_s13  ;;  %p2387_p6 = scmp.lt.u32.totalorder %s2383_s13, %s3052_s7 }
 0x367   :  { %p2389_p7 = pnand %p2387_p6, %p2384_p5 }
 0x369   :  { %2392 = shalt.err (!%p2389_p7)
}
 0x36a   :  { %s2399_s17 = smov 128   ;;  %s2400_s18 = smov 8  }
 0x36b   :  { %1790 = dma.vmem_to_hbm [thread:$0]  %s1785_s12, 256, %s3052_s7, [#allocation3], %s2399_s17, %s2399_s17, %s2400_s18  }
 0x36c   :  { %2393 = dma.done.wait [#allocation3], 256  }
 0x36d   :  { %2394 = vsyncadd [#allocation3], 4294967040 }
 0x36e   :  { %1794 = vsyncpa [#allocation3], 1 }

</bundles_post_ra>
